<compile_context>
chip_gen: v7x
topology: tpu7x:2x2x1
jax: 0.10.0
libtpu: 0.0.40
codegen_flags: <defaults>
</compile_context>

<pallas_src>
import functools

import jax
import jax.numpy as jnp
from jax import lax
from jax.experimental import pallas as pl
from jax.experimental.pallas import tpu as pltpu

LANES = 128
MAX_TILE_ROWS = 4096       # (4096, 128) f32 block = 2 MiB per input per buffer
NUM_CORE_SPLITS = 2        # v7x has 2 TCs; harmless sequential split on v5e/v6e


def _pod_scaling_loss_kernel(pred_ref, target_ref, out_ref, acc_ref, *,
                             alpha, beta, tile_rows, acc_rows, valid_rows,
                             tiles_per_core, n_full_tiles, needs_tail):
    c = pl.program_id(0)            # core-split index ("parallel")
    i = pl.program_id(1)            # row-tile index within this core ("arbitrary")
    gt = c * tiles_per_core + i     # global (unclamped) tile index

    @pl.when(i == 0)
    def _():
        acc_ref[...] = jnp.zeros_like(acc_ref)

    p = pred_ref[...].astype(jnp.float32)
    t = target_ref[...].astype(jnp.float32)
    d = p - t
    ad = jnp.abs(d)
    d2 = d * d
    # SmoothL1 (beta=1) + alpha*relu(-d)^2 + beta*relu(d)^2
    #   == where(|d| < 1, 0.5*d^2, |d| - 0.5) + where(d < 0, alpha, beta) * d^2
    # TODO(synk): on v7x (VALU-bound) compute d/|d|/compares in bf16 for bf16
    # inputs and keep only the squares + accumulation in f32.
    w = (jnp.where(ad < 1.0, 0.5 * d2, ad - 0.5)
         + jnp.where(d < 0.0, alpha, beta) * d2)

    def accumulate(wv):
        # Per-(sublane, lane) partial sums: stays on the VPU, no per-step XLU
        # cross-lane reduce and no per-step vreg->SMEM scalar move.
        acc_ref[...] += jnp.sum(wv.reshape(-1, acc_rows, LANES), axis=0)

    if not needs_tail:
        accumulate(w)
    else:
        @pl.when(gt < n_full_tiles)
        def _():
            accumulate(w)

        @pl.when(gt >= n_full_tiles)
        def _():
            # Boundary tile: rows past the real array (ragged last tile and/or
            # clamped duplicate tiles from the core split) contribute zero.
            row_ids = (gt * tile_rows
                       + lax.broadcasted_iota(jnp.int32, (tile_rows, LANES), 0))
            accumulate(jnp.where(row_ids < valid_rows, w, 0.0))

    @pl.when(i == tiles_per_core - 1)
    def _():
        out_ref[...] = acc_ref[...]


def pod_scaling_loss(pred, target, alpha=3.0, beta=1.5):
    """Mean weighted pod-scaling loss, computed in a Pallas TPU kernel."""
    assert pred.shape == target.shape
    n = pred.size

    # Flatten in native dtype (free reshape); upcast happens inside the kernel.
    p = pred.reshape(-1)
    t = target.reshape(-1)

    # TODO(synk): for n % 128 != 0, stream the unpadded arrays and lane-mask the
    # final block in-kernel (flat index < n) instead of paying this HBM pad copy.
    if n % LANES:
        pad = LANES - n % LANES
        p = jnp.pad(p, (0, pad))
        t = jnp.pad(t, (0, pad))
    rows = p.shape[0] // LANES
    p2 = p.reshape(rows, LANES)
    t2 = t.reshape(rows, LANES)

    # Largest sublane-packing-aligned row tile that fits the VMEM budget.
    itemsize = min(int(jnp.dtype(pred.dtype).itemsize),
                   int(jnp.dtype(target.dtype).itemsize))
    align = 8 * max(1, 4 // itemsize)        # 8 for f32, 16 for bf16, 32 for int8
    if rows >= align:
        tile_rows = min(MAX_TILE_ROWS, (rows // align) * align)
    else:
        tile_rows = rows                      # block == full array dim (allowed)
    acc_rows = 8 if tile_rows % 8 == 0 else tile_rows

    n_tiles = pl.cdiv(rows, tile_rows)
    num_splits = max(1, min(NUM_CORE_SPLITS, n_tiles))
    tiles_per_core = pl.cdiv(n_tiles, num_splits)
    total_tiles = num_splits * tiles_per_core
    n_full_tiles = rows // tile_rows          # tiles with no ragged rows
    needs_tail = total_tiles > n_full_tiles   # static: emit mask branch at all?

    if total_tiles > n_tiles:
        # Clamp duplicate (out-of-range) tile indices onto a valid block; their
        # contribution is masked to zero inside the kernel.
        def in_map(c, i):
            return (jnp.minimum(c * tiles_per_core + i, n_tiles - 1), 0)
    else:
        def in_map(c, i):
            return (c * tiles_per_core + i, 0)

    kernel = functools.partial(
        _pod_scaling_loss_kernel,
        alpha=float(alpha), beta=float(beta),
        tile_rows=tile_rows, acc_rows=acc_rows, valid_rows=rows,
        tiles_per_core=tiles_per_core, n_full_tiles=n_full_tiles,
        needs_tail=needs_tail)

    partials = pl.pallas_call(
        kernel,
        out_shape=jax.ShapeDtypeStruct((num_splits * acc_rows, LANES), jnp.float32),
        grid_spec=pltpu.PrefetchScalarGridSpec(
            num_scalar_prefetch=0,
            grid=(num_splits, tiles_per_core),
            in_specs=[
                pl.BlockSpec((tile_rows, LANES), in_map),
                pl.BlockSpec((tile_rows, LANES), in_map),
            ],
            out_specs=pl.BlockSpec((acc_rows, LANES), lambda c, i: (c, 0)),
            scratch_shapes=[pltpu.VMEM((acc_rows, LANES), jnp.float32)],
        ),
        compiler_params=pltpu.CompilerParams(
            dimension_semantics=("parallel", "arbitrary")),
    )(p2, t2)

    # Final cross-core / cross-lane reduce + mean scale in the wrapper.
    return jnp.sum(partials) * jnp.float32(1.0 / n)


def _reference_loss(pred, target, alpha=3.0, beta=1.5):
    d = pred.astype(jnp.float32) - target.astype(jnp.float32)
    ad = jnp.abs(d)
    base = jnp.where(ad < 1.0, 0.5 * d * d, ad - 0.5)
    under = jnp.maximum(-d, 0.0)
    over = jnp.maximum(d, 0.0)
    return jnp.mean(alpha * under ** 2 + beta * over ** 2 + base)


if __name__ == "__main__":
    key = jax.random.PRNGKey(0)
    k1, k2 = jax.random.split(key)
    # pred/target shaped like model outputs vs. labels (batch=2, ch=4, 16x16)
    pred = jax.random.normal(k1, (2, 4, 16, 16), dtype=jnp.float32)
    target = jax.random.normal(k2, (2, 4, 16, 16), dtype=jnp.float32)

    loss = pod_scaling_loss(pred, target, alpha=3.0, beta=1.5)
    loss = jax.block_until_ready(loss)

    ref = _reference_loss(pred, target, alpha=3.0, beta=1.5)
    assert jnp.allclose(loss, ref, rtol=1e-5, atol=1e-5), (loss, ref)
    print("KERNEL_OK")
</pallas_src>

<mosaic_0001>
module attributes {stable_mosaic.version = 11 : i64} {
  func.func @_pod_scaling_loss_kernel(%arg0: i32, %arg1: i32, %arg2: memref<16x128xf32, #tpu.memory_space<vmem>>, %arg3: memref<16x128xf32, #tpu.memory_space<vmem>>, %arg4: memref<8x128xf32, #tpu.memory_space<vmem>>, %arg5: memref<8x128xf32, #tpu.memory_space<vmem>>) attributes {dimension_semantics = [#tpu.dimension_semantics<parallel>, #tpu.dimension_semantics<arbitrary>], iteration_bounds = array<i64: 1, 1>, scalar_prefetch = 0 : i64, scratch_operands = 1 : i64, tpu.core_type = #tpu.core_type<tc>, window_params = [{transform_indices = @transform_0, window_bounds = array<i64: 16, 128>}, {transform_indices = @transform_1, window_bounds = array<i64: 16, 128>}, {transform_indices = @transform_2, window_bounds = array<i64: 8, 128>}]} {
    %c0_i32 = arith.constant 0 : i32
    %0 = arith.cmpi eq, %arg1, %c0_i32 : i32
    %1 = arith.extui %0 : i1 to i32
    %c0_i32_0 = arith.constant 0 : i32
    %2 = arith.cmpi ne, %1, %c0_i32_0 : i32
    scf.if %2 {
      %cst_16 = arith.constant 0.000000e+00 : f32
      %30 = vector.broadcast %cst_16 : f32 to vector<8x128xf32>
      %c0_17 = arith.constant 0 : index
      %c0_18 = arith.constant 0 : index
      %31 = vector.load %arg5[%c0_17, %c0_18] : memref<8x128xf32, #tpu.memory_space<vmem>>, vector<8x128xf32>
      tpu.vector_store %arg5[%c0_17, %c0_18], %30 {strides = array<i32>} : memref<8x128xf32, #tpu.memory_space<vmem>>, vector<8x128xf32>,
    } else {
    }
    %c0 = arith.constant 0 : index
    %c0_1 = arith.constant 0 : index
    %3 = vector.load %arg2[%c0, %c0_1] : memref<16x128xf32, #tpu.memory_space<vmem>>, vector<16x128xf32>
    %c0_2 = arith.constant 0 : index
    %c0_3 = arith.constant 0 : index
    %4 = vector.load %arg3[%c0_2, %c0_3] : memref<16x128xf32, #tpu.memory_space<vmem>>, vector<16x128xf32>
    %5 = arith.subf %3, %4 : vector<16x128xf32>
    %6 = math.absf %5 : vector<16x128xf32>
    %7 = arith.mulf %5, %5 : vector<16x128xf32>
    %cst = arith.constant 1.000000e+00 : f32
    %8 = vector.broadcast %cst : f32 to vector<16x128xf32>
    %9 = arith.cmpf olt, %6, %8 : vector<16x128xf32>
    %cst_4 = arith.constant 5.000000e-01 : f32
    %10 = vector.broadcast %cst_4 : f32 to vector<16x128xf32>
    %11 = arith.mulf %10, %7 : vector<16x128xf32>
    %cst_5 = arith.constant 5.000000e-01 : f32
    %12 = vector.broadcast %cst_5 : f32 to vector<16x128xf32>
    %13 = arith.subf %6, %12 : vector<16x128xf32>
    %14 = arith.select %9, %11, %13 : vector<16x128xi1>, vector<16x128xf32>
    %cst_6 = arith.constant 0.000000e+00 : f32
    %15 = vector.broadcast %cst_6 : f32 to vector<16x128xf32>
    %16 = arith.cmpf olt, %5, %15 : vector<16x128xf32>
    %cst_7 = arith.constant 3.000000e+00 : f32
    %cst_8 = arith.constant 1.500000e+00 : f32
    %17 = vector.broadcast %cst_7 : f32 to vector<16x128xf32>
    %18 = vector.broadcast %cst_8 : f32 to vector<16x128xf32>
    %19 = arith.select %16, %17, %18 : vector<16x128xi1>, vector<16x128xf32>
    %20 = arith.mulf %19, %7 : vector<16x128xf32>
    %21 = arith.addf %14, %20 : vector<16x128xf32>
    %c0_9 = arith.constant 0 : index
    %c0_10 = arith.constant 0 : index
    %22 = vector.load %arg5[%c0_9, %c0_10] : memref<8x128xf32, #tpu.memory_space<vmem>>, vector<8x128xf32>
    %23 = vector.shape_cast %21 : vector<16x128xf32> to vector<2x8x128xf32>
    %cst_11 = arith.constant dense<0.000000e+00> : vector<8x128xf32>
    %24 = vector.multi_reduction <add>, %23, %cst_11 [0] : vector<2x8x128xf32> to vector<8x128xf32>
    %25 = arith.addf %22, %24 : vector<8x128xf32>
    %c0_12 = arith.constant 0 : index
    %c0_13 = arith.constant 0 : index
    %26 = vector.load %arg5[%c0_12, %c0_13] : memref<8x128xf32, #tpu.memory_space<vmem>>, vector<8x128xf32>
    tpu.vector_store %arg5[%c0_12, %c0_13], %25 {strides = array<i32>} : memref<8x128xf32, #tpu.memory_space<vmem>>, vector<8x128xf32>,
    %c0_i32_14 = arith.constant 0 : i32
    %27 = arith.cmpi eq, %arg1, %c0_i32_14 : i32
    %28 = arith.extui %27 : i1 to i32
    %c0_i32_15 = arith.constant 0 : i32
    %29 = arith.cmpi ne, %28, %c0_i32_15 : i32
    scf.if %29 {
      %c0_16 = arith.constant 0 : index
      %c0_17 = arith.constant 0 : index
      %30 = vector.load %arg5[%c0_16, %c0_17] : memref<8x128xf32, #tpu.memory_space<vmem>>, vector<8x128xf32>
      %c0_18 = arith.constant 0 : index
      %c0_19 = arith.constant 0 : index
      %31 = vector.load %arg4[%c0_18, %c0_19] : memref<8x128xf32, #tpu.memory_space<vmem>>, vector<8x128xf32>
      tpu.vector_store %arg4[%c0_18, %c0_19], %30 {strides = array<i32>} : memref<8x128xf32, #tpu.memory_space<vmem>>, vector<8x128xf32>,
    } else {
    }
    return
  }
  func.func @transform_0(%arg0: i32, %arg1: i32) -> (i32, i32) {
    %c1_i32 = arith.constant 1 : i32
    %0 = arith.muli %arg0, %c1_i32 : i32
    %1 = arith.addi %0, %arg1 : i32
    %c0_i32 = arith.constant 0 : i32
    %c0_i32_0 = arith.constant 0 : i32
    return %1, %c0_i32 : i32, i32
  }
  func.func @transform_1(%arg0: i32, %arg1: i32) -> (i32, i32) {
    %c1_i32 = arith.constant 1 : i32
    %0 = arith.muli %arg0, %c1_i32 : i32
    %1 = arith.addi %0, %arg1 : i32
    %c0_i32 = arith.constant 0 : i32
    %c0_i32_0 = arith.constant 0 : i32
    return %1, %c0_i32 : i32, i32
  }
  func.func @transform_2(%arg0: i32, %arg1: i32) -> (i32, i32) {
    %c0_i32 = arith.constant 0 : i32
    %c0_i32_0 = arith.constant 0 : i32
    return %arg0, %c0_i32 : i32, i32
  }
}

</mosaic_0001>

<bundles_post_ra>
// kernel: tpu_custom_call.1
= control target key start
LH: loop header
LB: loop body
LE: loop exit
PB: predicated region body
PF: predicated region fallthrough
CT: control target
= control target key end

     0   :  { %7 = vsyncpa [#allocation4], 0  ;;  %s245_s0 = inlined_call_operand.hbm [shape: f32[16,128], index: 0, kind: input, shape index: {}]   ;;  %s246_s1 = inlined_call_operand.hbm [shape: f32[16,128], index: 1, kind: input, shape index: {}]   ;;  %s247_s2 = inlined_call_operand.hbm [shape: f32[8,128], index: 2, kind: output, shape index: {}]  }
   0x1   :  { %8 = vsyncpa [#allocation7], 0 }
   0x2   :  { %9 = vsyncpa [#allocation5], 0  ;;  %s188_s9 = smov [#allocation3]   ;;  %s116_s13 = scalar_lea.hbm %s245_s0, 256 }
   0x3   :  { %s19_s10 = sshll.u32 %s188_s9, 4  ;;  %p117_p0 = scmp.ne.s32.totalorder %s245_s0, %s116_s13  ;;  %s20_s10 = int_to_ptr.vmem [resolvable:$true] %s19_s10 }
   0x4   :  { %p120_p1 = scmp.lt.u32.totalorder %s116_s13, %s245_s0 }
   0x6   :  { %p122_p2 = pnand %p120_p1, %p117_p0 }
   0x8   :  { %125 = shalt.err (!%p122_p2)
}
   0x9   :  { %s126_s18 = scalar_lea.vmem %s20_s10, 256  ;;  %p131_p4 = scmp.lt.s32.totalorder %s20_s10, %s20_s10 }
   0xa   :  { %p127_p3 = scmp.ne.s32.totalorder %s20_s10, %s126_s18  ;;  %p132_p5 = scmp.lt.s32.totalorder %s126_s18, %s126_s18 }
   0xc   :  { %p133_p6 = por %p132_p5, %p131_p4 }
   0xe   :  { %p134_p7 = pnand %p133_p6, %p127_p3 }
  0x10   :  { %137 = shalt.err (!%p134_p7)
}
  0x11   :  { %s189_s19 = smov 128   ;;  %s190_s20 = smov 8  }
  0x12   :  { %25 = dma.hbm_to_vmem [thread:$0]  %s245_s0, 256, %s20_s10, [#allocation4], %s189_s19, %s189_s19, %s190_s20  }
  0x13   :  { %s191_s23 = smov [#allocation6]   ;;  %s138_s27 = scalar_lea.hbm %s246_s1, 256 }
  0x14   :  { %s35_s24 = sshll.u32 %s191_s23, 4  ;;  %p139_p8 = scmp.ne.s32.totalorder %s246_s1, %s138_s27  ;;  %s36_s24 = int_to_ptr.vmem [resolvable:$true] %s35_s24 }
  0x15   :  { %p142_p9 = scmp.lt.u32.totalorder %s138_s27, %s246_s1 }
  0x17   :  { %p144_p10 = pnand %p142_p9, %p139_p8 }
  0x19   :  { %147 = shalt.err (!%p144_p10)
}
  0x1a   :  { %s148_s4 = scalar_lea.vmem %s36_s24, 256  ;;  %p153_p12 = scmp.lt.s32.totalorder %s36_s24, %s36_s24 }
  0x1b   :  { %p149_p11 = scmp.ne.s32.totalorder %s36_s24, %s148_s4  ;;  %p154_p13 = scmp.lt.s32.totalorder %s148_s4, %s148_s4 }
  0x1d   :  { %p155_p0 = por %p154_p13, %p153_p12 }
  0x1f   :  { %p156_p1 = pnand %p155_p0, %p149_p11 }
  0x21   :  { %159 = shalt.err (!%p156_p1)
}
  0x22   :  { %41 = dma.hbm_to_vmem [thread:$0]  %s246_s1, 256, %s36_s24, [#allocation7], %s189_s19, %s189_s19, %s190_s20  }
  0x23   :  { %182 = dma.done.wait [#allocation4], 256  }
  0x24   :  { %183 = vsyncadd [#allocation4], 4294967040 }
  0x25   :  { %184 = dma.done.wait [#allocation7], 256  }
  0x26   :  { %185 = vsyncadd [#allocation7], 4294967040  ;;  %v57_v0 = vld [vmem:[#allocation3] sm:$0xff]  ;;  %v58_v1 = vld [vmem:[#allocation3 + $0x8] sm:$0xff]  ;;  %v192_v10 = vmov 1.5   ;;  %s193_s1 = smov [#allocation8]  }
  0x27   :  { %v59_v2 = vld [vmem:[#allocation6] sm:$0xff]  ;;  %v60_v3 = vld [vmem:[#allocation6 + $0x8] sm:$0xff]  ;;  %s98_s6 = sshll.u32 %s193_s1, 4  ;;  %s99_s6 = int_to_ptr.vmem [resolvable:$true] %s98_s6 }
  0x28   :  { %v61_v4 = vsub.f32 %v57_v0, %v59_v2  ;;  %v62_v5 = vsub.f32 %v58_v1, %v60_v3  ;;  %s160_s7 = scalar_lea.vmem %s99_s6, 128  ;;  %p165_p3 = scmp.lt.s32.totalorder %s99_s6, %s99_s6 }
  0x29   :  { %p161_p2 = scmp.ne.s32.totalorder %s99_s6, %s160_s7  ;;  %p166_p4 = scmp.lt.s32.totalorder %s160_s7, %s160_s7 }
  0x2a   :  { %v63_v6 = vand.u32 2147483647, %v61_v4  ;;  %v65_v7 = vmul.f32 %v61_v4, %v61_v4  ;;  %vm75_vm0 = vcmp.lt.f32.partialorder %v61_v4, 0.0  ;;  %v64_v8 = vand.u32 2147483647, %v62_v5 }
  0x2b   :  { %v66_v9 = vmul.f32 %v62_v5, %v62_v5  ;;  %vm76_vm1 = vcmp.lt.f32.partialorder %v62_v5, 0.0  ;;  %v77_v11 = vsel %vm75_vm0, 3.0, %v192_v10  ;;  %p167_p5 = por %p166_p4, %p165_p3 }
  0x2c   :  { %vm67_vm2 = vcmp.lt.f32.partialorder %v63_v6, 1.0  ;;  %v69_v12 = vmul.f32 0.5, %v65_v7  ;;  %v108_v13 = vadd.f32 -0.5, %v63_v6  ;;  %v78_v14 = vsel %vm76_vm1, 3.0, %v192_v10 }
  0x2d   :  { %vm68_vm3 = vcmp.lt.f32.partialorder %v64_v8, 1.0  ;;  %v70_v15 = vmul.f32 0.5, %v66_v9  ;;  %v109_v16 = vadd.f32 -0.5, %v64_v8  ;;  %v79_v17 = vmul.f32 %v77_v11, %v65_v7  ;;  %p168_p6 = pnand %p167_p5, %p161_p2 }
  0x2e   :  { %v73_v18 = vsel %vm67_vm2, %v69_v12, %v108_v13  ;;  %v80_v19 = vmul.f32 %v78_v14, %v66_v9 }
  0x2f   :  { %v74_v20 = vsel %vm68_vm3, %v70_v15, %v109_v16  ;;  %v81_v21 = vadd.f32 %v79_v17, %v73_v18 }
  0x30   :  { %v82_v22 = vadd.f32 %v80_v19, %v74_v20 }
  0x32   :  { %v84_v23 = vadd.f32 %v82_v22, %v81_v21 }
  0x34   :  { %91 = vst [vmem:[#allocation8] sm:$0xff] %v84_v23 }
  0x35   :  { %171 = shalt.err (!%p168_p6)
}
  0x36   :  { %s172_s10 = scalar_lea.hbm %s247_s2, 128 }
  0x37   :  { %p173_p7 = scmp.ne.s32.totalorder %s247_s2, %s172_s10  ;;  %p176_p8 = scmp.lt.u32.totalorder %s172_s10, %s247_s2 }
  0x39   :  { %p178_p9 = pnand %p176_p8, %p173_p7 }
  0x3b   :  { %181 = shalt.err (!%p178_p9)
}
  0x3c   :  { %101 = dma.vmem_to_hbm [thread:$0]  %s99_s6, 128, %s247_s2, [#allocation5]  }
  0x3d   :  { %186 = dma.done.wait [#allocation5], 128  }
  0x3e   :  { %187 = vsyncadd [#allocation5], 4294967168 }
  0x3f   :  { %105 = vsyncpa [#allocation4], 1 }
  0x40   :  { %106 = vsyncpa [#allocation7], 1 }
  0x41   :  { %107 = vsyncpa [#allocation5], 1 }

</bundles_post_ra>
